<compile_context>
chip_gen: v7x
topology: tpu7x:2x2x1
jax: 0.10.0
libtpu: 0.0.40
codegen_flags: <defaults>
</compile_context>

<pallas_src>
import functools
import math

import jax
import jax.numpy as jnp
from jax.experimental import pallas as pl
from jax.experimental.pallas import tpu as pltpu


def _cross_attn_kernel(x_ref, mem_ref, wqT_ref, wkvT_ref, woT_ref, o_ref, ctx_ref,
                       *, n_heads, causal):
    bb, Tq, D = x_ref.shape
    Tk = mem_ref.shape[1]
    dh = D // n_heads
    mm_dtype = x_ref.dtype  # matmul-operand dtype (f32 or bf16); accumulation is f32

    # --- Projections: flatten batch rows (tile-aligned outer reshape) and do
    # full-width matmuls so the MXU sees (bb*T, D) x (D, D/2D) instead of tiny ops.
    x2 = x_ref[...].reshape(bb * Tq, D)
    m2 = mem_ref[...].reshape(bb * Tk, D)
    q = jnp.dot(x2, wqT_ref[...], preferred_element_type=jnp.float32)      # (bb*Tq, D), scale folded
    kv = jnp.dot(m2, wkvT_ref[...], preferred_element_type=jnp.float32)    # (bb*Tk, 2D) fused K|V

    q3 = q.reshape(bb, Tq, D).astype(mm_dtype)
    k3 = kv[:, :D].reshape(bb, Tk, D).astype(mm_dtype)
    v3 = kv[:, D:].reshape(bb, Tk, D).astype(mm_dtype)

    # Additive causal mask, built once per grid step (not per head).
    # NOTE: with Tq != Tk this aligns query i with key i from the start of the memory
    # sequence (matches the bundled reference; confirm if causal=True is ever used
    # with unequal lengths).
    if causal:
        qi = jax.lax.broadcasted_iota(jnp.int32, (Tq, Tk), 0)
        kj = jax.lax.broadcasted_iota(jnp.int32, (Tq, Tk), 1)
        neg = jnp.where(kj <= qi, 0.0, -jnp.inf).astype(jnp.float32)
    else:
        neg = None

    # --- Per-head attention, batched over the batch-row block (3-D einsums with a
    # single batch dim). Each head's context goes straight into the VMEM scratch slab
    # at its lane range: no jnp.concatenate, no per-head live accumulation in vregs.
    for h in range(n_heads):
        lo, hi = h * dh, (h + 1) * dh
        qh = q3[:, :, lo:hi]                                              # (bb, Tq, dh)
        kh = k3[:, :, lo:hi]                                              # (bb, Tk, dh)
        vh = v3[:, :, lo:hi]                                              # (bb, Tk, dh)

        s = jnp.einsum('bqd,bkd->bqk', qh, kh,
                       preferred_element_type=jnp.float32)                # (bb, Tq, Tk)
        if neg is not None:
            s = s + neg

        # Numerically-stable softmax (f32) with deferred, EXACT normalization:
        # divide the (Tq, dh) context instead of the (Tq, Tk) probabilities.
        mmax = jnp.max(s, axis=-1, keepdims=True)
        p = jnp.exp(s - mmax)
        l = jnp.sum(p, axis=-1, keepdims=True)                            # (bb, Tq, 1)
        ctx_h = jnp.einsum('bqk,bkd->bqd', p.astype(mm_dtype), vh,
                           preferred_element_type=jnp.float32)            # (bb, Tq, dh)
        ctx_h = ctx_h / l
        ctx_ref[:, :, lo:hi] = ctx_h.astype(ctx_ref.dtype)

    # --- One full-K output projection over the assembled context slab.
    ctx2 = ctx_ref[...].reshape(bb * Tq, D)
    out = jnp.dot(ctx2, woT_ref[...], preferred_element_type=jnp.float32)  # (bb*Tq, D)
    o_ref[...] = out.reshape(bb, Tq, D).astype(o_ref.dtype)


def cross_attention(x, mem, in_proj_weight, out_proj_weight, n_heads,
                    causal=False, compute_dtype=None, batch_block=None):
    """Equivalent of CrossAttention.forward with dropout=0.0 (resid_dropout is identity).

    compute_dtype: optional lower-precision matmul-operand dtype (e.g. jnp.bfloat16);
                   accumulation and softmax stay in f32, output keeps x.dtype.
    batch_block:   batch rows per grid step. Default = whole batch (one step). Pass
                   B//2 (even) to expose two "parallel" steps for v7x's 2 TensorCores.
    """
    B, Tq, D = x.shape
    _, Tk, _ = mem.shape
    assert D % n_heads == 0
    dh = D // n_heads
    scale = 1.0 / math.sqrt(dh)
    out_dtype = x.dtype

    wq, wk, wv = jnp.split(in_proj_weight, 3, axis=0)   # each (D, D)
    wqT = (wq * scale).T                                # fold softmax scale into Q projection
    wkvT = jnp.concatenate([wk.T, wv.T], axis=1)        # fused (D, 2D) [Wk^T | Wv^T]
    woT = out_proj_weight.T                             # (D, D)

    if compute_dtype is not None:
        x = x.astype(compute_dtype)
        mem = mem.astype(compute_dtype)
        wqT = wqT.astype(compute_dtype)
        wkvT = wkvT.astype(compute_dtype)
        woT = woT.astype(compute_dtype)
    mm_dtype = x.dtype

    if batch_block is None:
        batch_block = B                                  # whole batch in one grid step
    assert B % batch_block == 0
    grid = (B // batch_block,)

    kernel = functools.partial(_cross_attn_kernel, n_heads=n_heads, causal=causal)

    return pl.pallas_call(
        kernel,
        out_shape=jax.ShapeDtypeStruct((B, Tq, D), out_dtype),
        grid_spec=pltpu.PrefetchScalarGridSpec(
            num_scalar_prefetch=0,
            grid=grid,
            in_specs=[
                pl.BlockSpec((batch_block, Tq, D), lambda i: (i, 0, 0)),   # x block
                pl.BlockSpec((batch_block, Tk, D), lambda i: (i, 0, 0)),   # mem block
                pl.BlockSpec((D, D), lambda i: (0, 0)),       # Wq^T (scaled), resident
                pl.BlockSpec((D, 2 * D), lambda i: (0, 0)),   # [Wk^T | Wv^T], resident
                pl.BlockSpec((D, D), lambda i: (0, 0)),       # Wo^T, resident
            ],
            out_specs=pl.BlockSpec((batch_block, Tq, D), lambda i: (i, 0, 0)),
            scratch_shapes=[pltpu.VMEM((batch_block, Tq, D), mm_dtype)],   # context slab
        ),
        compiler_params=pltpu.CompilerParams(
            dimension_semantics=("parallel",),
            vmem_limit_bytes=32 * 1024 * 1024,
        ),
    )(x, mem, wqT, wkvT, woT)


def _reference(x, mem, in_proj_weight, out_proj_weight, n_heads, causal=False):
    """Pure-JAX reference matching torch.nn.MultiheadAttention (bias=False, dropout=0)."""
    B, Tq, D = x.shape
    Tk = mem.shape[1]
    dh = D // n_heads
    wq, wk, wv = jnp.split(in_proj_weight, 3, axis=0)
    q = x @ wq.T
    k = mem @ wk.T
    v = mem @ wv.T
    q = q.reshape(B, Tq, n_heads, dh).transpose(0, 2, 1, 3)
    k = k.reshape(B, Tk, n_heads, dh).transpose(0, 2, 1, 3)
    v = v.reshape(B, Tk, n_heads, dh).transpose(0, 2, 1, 3)
    s = jnp.einsum("bhqd,bhkd->bhqk", q, k) / math.sqrt(dh)
    if causal:
        qi = jnp.arange(Tq)[:, None]
        kj = jnp.arange(Tk)[None, :]
        s = jnp.where(kj <= qi, s, -jnp.inf)
    p = jax.nn.softmax(s, axis=-1)
    ctx = jnp.einsum("bhqk,bhkd->bhqd", p, v)
    ctx = ctx.transpose(0, 2, 1, 3).reshape(B, Tq, D)
    return ctx @ out_proj_weight.T


if __name__ == "__main__":
    # Small shapes consistent with the module: d_model=32, n_heads=4, batch=2, seq_q=8, seq_kv=16.
    B, Tq, Tk, D, H = 2, 8, 16, 32, 4

    key = jax.random.PRNGKey(0)
    kx, km, kin, kout = jax.random.split(key, 4)

    x = jax.random.normal(kx, (B, Tq, D), dtype=jnp.float32)
    mem = jax.random.normal(km, (B, Tk, D), dtype=jnp.float32)

    # Deterministic synthetic parameters (shapes match nn.MultiheadAttention with bias=False).
    in_proj_weight = jax.random.normal(kin, (3 * D, D), dtype=jnp.float32) * (1.0 / math.sqrt(D))
    out_proj_weight = jax.random.normal(kout, (D, D), dtype=jnp.float32) * (1.0 / math.sqrt(D))

    ref = _reference(x, mem, in_proj_weight, out_proj_weight, n_heads=H, causal=False)

    # 1) Default: f32 compute, whole batch in one grid step.
    out = cross_attention(x, mem, in_proj_weight, out_proj_weight, n_heads=H, causal=False)
    out = jax.block_until_ready(out)
    assert out.shape == (B, Tq, D)
    err = float(jnp.max(jnp.abs(out - ref)))
    assert jnp.allclose(out, ref, rtol=1e-2, atol=1e-2), err

    # 2) Two "parallel" grid steps (v7x dual-TensorCore-friendly split).
    out2 = cross_attention(x, mem, in_proj_weight, out_proj_weight, n_heads=H,
                           causal=False, batch_block=1)
    out2 = jax.block_until_ready(out2)
    err2 = float(jnp.max(jnp.abs(out2 - ref)))
    assert jnp.allclose(out2, ref, rtol=1e-2, atol=1e-2), err2

    # 3) bf16 matmul operands / f32 accumulation (loose sanity tolerance: bf16 operands).
    out_bf16 = cross_attention(x, mem, in_proj_weight, out_proj_weight, n_heads=H,
                               causal=False, compute_dtype=jnp.bfloat16)
    out_bf16 = jax.block_until_ready(out_bf16)
    err_bf16 = float(jnp.max(jnp.abs(out_bf16 - ref)))
    assert err_bf16 < 0.25, err_bf16

    print("KERNEL_OK")
</pallas_src>

<mosaic_0001>
module attributes {stable_mosaic.version = 11 : i64} {
  func.func @_cross_attn_kernel(%arg0: i32, %arg1: memref<2x8x32xf32, #tpu.memory_space<vmem>>, %arg2: memref<2x16x32xf32, #tpu.memory_space<vmem>>, %arg3: memref<32x32xf32, #tpu.memory_space<vmem>>, %arg4: memref<32x64xf32, #tpu.memory_space<vmem>>, %arg5: memref<32x32xf32, #tpu.memory_space<vmem>>, %arg6: memref<2x8x32xf32, #tpu.memory_space<vmem>>, %arg7: memref<2x8x32xf32, #tpu.memory_space<vmem>>) attributes {dimension_semantics = [#tpu.dimension_semantics<parallel>], iteration_bounds = array<i64: 1>, scalar_prefetch = 0 : i64, scratch_operands = 1 : i64, tpu.core_type = #tpu.core_type<tc>, window_params = [{transform_indices = @transform_0, window_bounds = array<i64: 2, 8, 32>}, {transform_indices = @transform_1, window_bounds = array<i64: 2, 16, 32>}, {pipeline_mode = #tpu.pipeline_mode<synchronous>, transform_indices = @transform_2, window_bounds = array<i64: 32, 32>}, {pipeline_mode = #tpu.pipeline_mode<synchronous>, transform_indices = @transform_3, window_bounds = array<i64: 32, 64>}, {pipeline_mode = #tpu.pipeline_mode<synchronous>, transform_indices = @transform_4, window_bounds = array<i64: 32, 32>}, {transform_indices = @transform_5, window_bounds = array<i64: 2, 8, 32>}]} {
    %c0 = arith.constant 0 : index
    %c0_0 = arith.constant 0 : index
    %c0_1 = arith.constant 0 : index
    %0 = vector.load %arg1[%c0, %c0_0, %c0_1] : memref<2x8x32xf32, #tpu.memory_space<vmem>>, vector<2x8x32xf32>
    %1 = vector.shape_cast %0 : vector<2x8x32xf32> to vector<16x32xf32>
    %c0_2 = arith.constant 0 : index
    %c0_3 = arith.constant 0 : index
    %c0_4 = arith.constant 0 : index
    %2 = vector.load %arg2[%c0_2, %c0_3, %c0_4] : memref<2x16x32xf32, #tpu.memory_space<vmem>>, vector<2x16x32xf32>
    %3 = vector.shape_cast %2 : vector<2x16x32xf32> to vector<32x32xf32>
    %c0_5 = arith.constant 0 : index
    %c0_6 = arith.constant 0 : index
    %4 = vector.load %arg3[%c0_5, %c0_6] : memref<32x32xf32, #tpu.memory_space<vmem>>, vector<32x32xf32>
    %cst = arith.constant dense<0.000000e+00> : vector<16x32xf32>
    %5 = tpu.matmul %1, %4, %cst {dimension_numbers = #tpu.dot_dimension_numbers<[1], [0], [0], [1], [0, 0, 1, 1], [], []>} : vector<16x32xf32>, vector<32x32xf32>, vector<16x32xf32> -> vector<16x32xf32>
    %c0_7 = arith.constant 0 : index
    %c0_8 = arith.constant 0 : index
    %6 = vector.load %arg4[%c0_7, %c0_8] : memref<32x64xf32, #tpu.memory_space<vmem>>, vector<32x64xf32>
    %cst_9 = arith.constant dense<0.000000e+00> : vector<32x64xf32>
    %7 = tpu.matmul %3, %6, %cst_9 {dimension_numbers = #tpu.dot_dimension_numbers<[1], [0], [0], [1], [0, 0, 1, 1], [], []>} : vector<32x32xf32>, vector<32x64xf32>, vector<32x64xf32> -> vector<32x64xf32>
    %8 = vector.shape_cast %5 : vector<16x32xf32> to vector<2x8x32xf32>
    %9 = vector.extract_strided_slice %7 {offsets = [0, 0], sizes = [32, 32], strides = [1, 1]} : vector<32x64xf32> to vector<32x32xf32>
    %10 = vector.shape_cast %9 : vector<32x32xf32> to vector<2x16x32xf32>
    %11 = vector.extract_strided_slice %7 {offsets = [0, 32], sizes = [32, 32], strides = [1, 1]} : vector<32x64xf32> to vector<32x32xf32>
    %12 = vector.shape_cast %11 : vector<32x32xf32> to vector<2x16x32xf32>
    %13 = vector.extract_strided_slice %8 {offsets = [0, 0, 0], sizes = [2, 8, 8], strides = [1, 1, 1]} : vector<2x8x32xf32> to vector<2x8x8xf32>
    %14 = vector.extract_strided_slice %10 {offsets = [0, 0, 0], sizes = [2, 16, 8], strides = [1, 1, 1]} : vector<2x16x32xf32> to vector<2x16x8xf32>
    %15 = vector.extract_strided_slice %12 {offsets = [0, 0, 0], sizes = [2, 16, 8], strides = [1, 1, 1]} : vector<2x16x32xf32> to vector<2x16x8xf32>
    "tpu.trace_start"() <{level = 10 : i32, message = "bqd,bkd->bqk"}> : () -> ()
    %cst_10 = arith.constant dense<0.000000e+00> : vector<2x8x16xf32>
    %16 = tpu.matmul %13, %14, %cst_10 {dimension_numbers = #tpu.dot_dimension_numbers<[2], [2], [1], [1], [0, 0, 0, 1, 1, 1], [0], [0]>} : vector<2x8x8xf32>, vector<2x16x8xf32>, vector<2x8x16xf32> -> vector<2x8x16xf32>
    "tpu.trace_stop"() : () -> ()
    %cst_11 = arith.constant dense<0xFF800000> : vector<2x8xf32>
    %17 = vector.multi_reduction <maximumf>, %16, %cst_11 [2] : vector<2x8x16xf32> to vector<2x8xf32>
    %18 = vector.shape_cast %17 : vector<2x8xf32> to vector<2x8x1xf32>
    %19 = vector.broadcast %18 : vector<2x8x1xf32> to vector<2x8x16xf32>
    %20 = arith.subf %16, %19 : vector<2x8x16xf32>
    %21 = math.exp %20 : vector<2x8x16xf32>
    %cst_12 = arith.constant dense<0.000000e+00> : vector<2x8xf32>
    %22 = vector.multi_reduction <add>, %21, %cst_12 [2] : vector<2x8x16xf32> to vector<2x8xf32>
    %23 = vector.shape_cast %22 : vector<2x8xf32> to vector<2x8x1xf32>
    "tpu.trace_start"() <{level = 10 : i32, message = "bqk,bkd->bqd"}> : () -> ()
    %cst_13 = arith.constant dense<0.000000e+00> : vector<2x8x8xf32>
    %24 = tpu.matmul %21, %15, %cst_13 {dimension_numbers = #tpu.dot_dimension_numbers<[2], [1], [1], [2], [0, 0, 0, 1, 1, 2], [0], [0]>} : vector<2x8x16xf32>, vector<2x16x8xf32>, vector<2x8x8xf32> -> vector<2x8x8xf32>
    "tpu.trace_stop"() : () -> ()
    %25 = vector.broadcast %23 : vector<2x8x1xf32> to vector<2x8x8xf32>
    %26 = arith.divf %24, %25 : vector<2x8x8xf32>
    %c0_14 = arith.constant 0 : index
    %c0_15 = arith.constant 0 : index
    %c0_16 = arith.constant 0 : index
    %27 = vector.load %arg7[%c0_14, %c0_15, %c0_16] : memref<2x8x32xf32, #tpu.memory_space<vmem>>, vector<2x8x8xf32>
    tpu.vector_store %arg7[%c0_14, %c0_15, %c0_16], %26 {strides = array<i32>} : memref<2x8x32xf32, #tpu.memory_space<vmem>>, vector<2x8x8xf32>,
    %28 = vector.extract_strided_slice %8 {offsets = [0, 0, 8], sizes = [2, 8, 8], strides = [1, 1, 1]} : vector<2x8x32xf32> to vector<2x8x8xf32>
    %29 = vector.extract_strided_slice %10 {offsets = [0, 0, 8], sizes = [2, 16, 8], strides = [1, 1, 1]} : vector<2x16x32xf32> to vector<2x16x8xf32>
    %30 = vector.extract_strided_slice %12 {offsets = [0, 0, 8], sizes = [2, 16, 8], strides = [1, 1, 1]} : vector<2x16x32xf32> to vector<2x16x8xf32>
    "tpu.trace_start"() <{level = 10 : i32, message = "bqd,bkd->bqk"}> : () -> ()
    %cst_17 = arith.constant dense<0.000000e+00> : vector<2x8x16xf32>
    %31 = tpu.matmul %28, %29, %cst_17 {dimension_numbers = #tpu.dot_dimension_numbers<[2], [2], [1], [1], [0, 0, 0, 1, 1, 1], [0], [0]>} : vector<2x8x8xf32>, vector<2x16x8xf32>, vector<2x8x16xf32> -> vector<2x8x16xf32>
    "tpu.trace_stop"() : () -> ()
    %cst_18 = arith.constant dense<0xFF800000> : vector<2x8xf32>
    %32 = vector.multi_reduction <maximumf>, %31, %cst_18 [2] : vector<2x8x16xf32> to vector<2x8xf32>
    %33 = vector.shape_cast %32 : vector<2x8xf32> to vector<2x8x1xf32>
    %34 = vector.broadcast %33 : vector<2x8x1xf32> to vector<2x8x16xf32>
    %35 = arith.subf %31, %34 : vector<2x8x16xf32>
    %36 = math.exp %35 : vector<2x8x16xf32>
    %cst_19 = arith.constant dense<0.000000e+00> : vector<2x8xf32>
    %37 = vector.multi_reduction <add>, %36, %cst_19 [2] : vector<2x8x16xf32> to vector<2x8xf32>
    %38 = vector.shape_cast %37 : vector<2x8xf32> to vector<2x8x1xf32>
    "tpu.trace_start"() <{level = 10 : i32, message = "bqk,bkd->bqd"}> : () -> ()
    %cst_20 = arith.constant dense<0.000000e+00> : vector<2x8x8xf32>
    %39 = tpu.matmul %36, %30, %cst_20 {dimension_numbers = #tpu.dot_dimension_numbers<[2], [1], [1], [2], [0, 0, 0, 1, 1, 2], [0], [0]>} : vector<2x8x16xf32>, vector<2x16x8xf32>, vector<2x8x8xf32> -> vector<2x8x8xf32>
    "tpu.trace_stop"() : () -> ()
    %40 = vector.broadcast %38 : vector<2x8x1xf32> to vector<2x8x8xf32>
    %41 = arith.divf %39, %40 : vector<2x8x8xf32>
    %c0_21 = arith.constant 0 : index
    %c0_22 = arith.constant 0 : index
    %c8 = arith.constant 8 : index
    %42 = vector.load %arg7[%c0_21, %c0_22, %c8] : memref<2x8x32xf32, #tpu.memory_space<vmem>>, vector<2x8x8xf32>
    tpu.vector_store %arg7[%c0_21, %c0_22, %c8], %41 {strides = array<i32>} : memref<2x8x32xf32, #tpu.memory_space<vmem>>, vector<2x8x8xf32>,
    %43 = vector.extract_strided_slice %8 {offsets = [0, 0, 16], sizes = [2, 8, 8], strides = [1, 1, 1]} : vector<2x8x32xf32> to vector<2x8x8xf32>
    %44 = vector.extract_strided_slice %10 {offsets = [0, 0, 16], sizes = [2, 16, 8], strides = [1, 1, 1]} : vector<2x16x32xf32> to vector<2x16x8xf32>
    %45 = vector.extract_strided_slice %12 {offsets = [0, 0, 16], sizes = [2, 16, 8], strides = [1, 1, 1]} : vector<2x16x32xf32> to vector<2x16x8xf32>
    "tpu.trace_start"() <{level = 10 : i32, message = "bqd,bkd->bqk"}> : () -> ()
    %cst_23 = arith.constant dense<0.000000e+00> : vector<2x8x16xf32>
    %46 = tpu.matmul %43, %44, %cst_23 {dimension_numbers = #tpu.dot_dimension_numbers<[2], [2], [1], [1], [0, 0, 0, 1, 1, 1], [0], [0]>} : vector<2x8x8xf32>, vector<2x16x8xf32>, vector<2x8x16xf32> -> vector<2x8x16xf32>
    "tpu.trace_stop"() : () -> ()
    %cst_24 = arith.constant dense<0xFF800000> : vector<2x8xf32>
    %47 = vector.multi_reduction <maximumf>, %46, %cst_24 [2] : vector<2x8x16xf32> to vector<2x8xf32>
    %48 = vector.shape_cast %47 : vector<2x8xf32> to vector<2x8x1xf32>
    %49 = vector.broadcast %48 : vector<2x8x1xf32> to vector<2x8x16xf32>
    %50 = arith.subf %46, %49 : vector<2x8x16xf32>
    %51 = math.exp %50 : vector<2x8x16xf32>
    %cst_25 = arith.constant dense<0.000000e+00> : vector<2x8xf32>
    %52 = vector.multi_reduction <add>, %51, %cst_25 [2] : vector<2x8x16xf32> to vector<2x8xf32>
    %53 = vector.shape_cast %52 : vector<2x8xf32> to vector<2x8x1xf32>
    "tpu.trace_start"() <{level = 10 : i32, message = "bqk,bkd->bqd"}> : () -> ()
    %cst_26 = arith.constant dense<0.000000e+00> : vector<2x8x8xf32>
    %54 = tpu.matmul %51, %45, %cst_26 {dimension_numbers = #tpu.dot_dimension_numbers<[2], [1], [1], [2], [0, 0, 0, 1, 1, 2], [0], [0]>} : vector<2x8x16xf32>, vector<2x16x8xf32>, vector<2x8x8xf32> -> vector<2x8x8xf32>
    "tpu.trace_stop"() : () -> ()
    %55 = vector.broadcast %53 : vector<2x8x1xf32> to vector<2x8x8xf32>
    %56 = arith.divf %54, %55 : vector<2x8x8xf32>
    %c0_27 = arith.constant 0 : index
    %c0_28 = arith.constant 0 : index
    %c16 = arith.constant 16 : index
    %57 = vector.load %arg7[%c0_27, %c0_28, %c16] : memref<2x8x32xf32, #tpu.memory_space<vmem>>, vector<2x8x8xf32>
    tpu.vector_store %arg7[%c0_27, %c0_28, %c16], %56 {strides = array<i32>} : memref<2x8x32xf32, #tpu.memory_space<vmem>>, vector<2x8x8xf32>,
    %58 = vector.extract_strided_slice %8 {offsets = [0, 0, 24], sizes = [2, 8, 8], strides = [1, 1, 1]} : vector<2x8x32xf32> to vector<2x8x8xf32>
    %59 = vector.extract_strided_slice %10 {offsets = [0, 0, 24], sizes = [2, 16, 8], strides = [1, 1, 1]} : vector<2x16x32xf32> to vector<2x16x8xf32>
    %60 = vector.extract_strided_slice %12 {offsets = [0, 0, 24], sizes = [2, 16, 8], strides = [1, 1, 1]} : vector<2x16x32xf32> to vector<2x16x8xf32>
    "tpu.trace_start"() <{level = 10 : i32, message = "bqd,bkd->bqk"}> : () -> ()
    %cst_29 = arith.constant dense<0.000000e+00> : vector<2x8x16xf32>
    %61 = tpu.matmul %58, %59, %cst_29 {dimension_numbers = #tpu.dot_dimension_numbers<[2], [2], [1], [1], [0, 0, 0, 1, 1, 1], [0], [0]>} : vector<2x8x8xf32>, vector<2x16x8xf32>, vector<2x8x16xf32> -> vector<2x8x16xf32>
    "tpu.trace_stop"() : () -> ()
    %cst_30 = arith.constant dense<0xFF800000> : vector<2x8xf32>
    %62 = vector.multi_reduction <maximumf>, %61, %cst_30 [2] : vector<2x8x16xf32> to vector<2x8xf32>
    %63 = vector.shape_cast %62 : vector<2x8xf32> to vector<2x8x1xf32>
    %64 = vector.broadcast %63 : vector<2x8x1xf32> to vector<2x8x16xf32>
    %65 = arith.subf %61, %64 : vector<2x8x16xf32>
    %66 = math.exp %65 : vector<2x8x16xf32>
    %cst_31 = arith.constant dense<0.000000e+00> : vector<2x8xf32>
    %67 = vector.multi_reduction <add>, %66, %cst_31 [2] : vector<2x8x16xf32> to vector<2x8xf32>
    %68 = vector.shape_cast %67 : vector<2x8xf32> to vector<2x8x1xf32>
    "tpu.trace_start"() <{level = 10 : i32, message = "bqk,bkd->bqd"}> : () -> ()
    %cst_32 = arith.constant dense<0.000000e+00> : vector<2x8x8xf32>
    %69 = tpu.matmul %66, %60, %cst_32 {dimension_numbers = #tpu.dot_dimension_numbers<[2], [1], [1], [2], [0, 0, 0, 1, 1, 2], [0], [0]>} : vector<2x8x16xf32>, vector<2x16x8xf32>, vector<2x8x8xf32> -> vector<2x8x8xf32>
    "tpu.trace_stop"() : () -> ()
    %70 = vector.broadcast %68 : vector<2x8x1xf32> to vector<2x8x8xf32>
    %71 = arith.divf %69, %70 : vector<2x8x8xf32>
    %c0_33 = arith.constant 0 : index
    %c0_34 = arith.constant 0 : index
    %c24 = arith.constant 24 : index
    %72 = vector.load %arg7[%c0_33, %c0_34, %c24] : memref<2x8x32xf32, #tpu.memory_space<vmem>>, vector<2x8x8xf32>
    tpu.vector_store %arg7[%c0_33, %c0_34, %c24], %71 {strides = array<i32>} : memref<2x8x32xf32, #tpu.memory_space<vmem>>, vector<2x8x8xf32>,
    %c0_35 = arith.constant 0 : index
    %c0_36 = arith.constant 0 : index
    %c0_37 = arith.constant 0 : index
    %73 = vector.load %arg7[%c0_35, %c0_36, %c0_37] : memref<2x8x32xf32, #tpu.memory_space<vmem>>, vector<2x8x32xf32>
    %74 = vector.shape_cast %73 : vector<2x8x32xf32> to vector<16x32xf32>
    %c0_38 = arith.constant 0 : index
    %c0_39 = arith.constant 0 : index
    %75 = vector.load %arg5[%c0_38, %c0_39] : memref<32x32xf32, #tpu.memory_space<vmem>>, vector<32x32xf32>
    %cst_40 = arith.constant dense<0.000000e+00> : vector<16x32xf32>
    %76 = tpu.matmul %74, %75, %cst_40 {dimension_numbers = #tpu.dot_dimension_numbers<[1], [0], [0], [1], [0, 0, 1, 1], [], []>} : vector<16x32xf32>, vector<32x32xf32>, vector<16x32xf32> -> vector<16x32xf32>
    %77 = vector.shape_cast %76 : vector<16x32xf32> to vector<2x8x32xf32>
    %c0_41 = arith.constant 0 : index
    %c0_42 = arith.constant 0 : index
    %c0_43 = arith.constant 0 : index
    %78 = vector.load %arg6[%c0_41, %c0_42, %c0_43] : memref<2x8x32xf32, #tpu.memory_space<vmem>>, vector<2x8x32xf32>
    tpu.vector_store %arg6[%c0_41, %c0_42, %c0_43], %77 {strides = array<i32>} : memref<2x8x32xf32, #tpu.memory_space<vmem>>, vector<2x8x32xf32>,
    return
  }
  func.func @transform_0(%arg0: i32) -> (i32, i32, i32) {
    %c0_i32 = arith.constant 0 : i32
    %c0_i32_0 = arith.constant 0 : i32
    %c0_i32_1 = arith.constant 0 : i32
    return %arg0, %c0_i32, %c0_i32_0 : i32, i32, i32
  }
  func.func @transform_1(%arg0: i32) -> (i32, i32, i32) {
    %c0_i32 = arith.constant 0 : i32
    %c0_i32_0 = arith.constant 0 : i32
    %c0_i32_1 = arith.constant 0 : i32
    return %arg0, %c0_i32, %c0_i32_0 : i32, i32, i32
  }
  func.func @transform_2(%arg0: i32) -> (i32, i32) {
    %c0_i32 = arith.constant 0 : i32
    %c0_i32_0 = arith.constant 0 : i32
    %c0_i32_1 = arith.constant 0 : i32
    return %c0_i32, %c0_i32_0 : i32, i32
  }
  func.func @transform_3(%arg0: i32) -> (i32, i32) {
    %c0_i32 = arith.constant 0 : i32
    %c0_i32_0 = arith.constant 0 : i32
    %c0_i32_1 = arith.constant 0 : i32
    return %c0_i32, %c0_i32_0 : i32, i32
  }
  func.func @transform_4(%arg0: i32) -> (i32, i32) {
    %c0_i32 = arith.constant 0 : i32
    %c0_i32_0 = arith.constant 0 : i32
    %c0_i32_1 = arith.constant 0 : i32
    return %c0_i32, %c0_i32_0 : i32, i32
  }
  func.func @transform_5(%arg0: i32) -> (i32, i32, i32) {
    %c0_i32 = arith.constant 0 : i32
    %c0_i32_0 = arith.constant 0 : i32
    %c0_i32_1 = arith.constant 0 : i32
    return %arg0, %c0_i32, %c0_i32_0 : i32, i32, i32
  }
}

</mosaic_0001>

<bundles_post_ra>
// kernel: tpu_custom_call.1
= control target key start
LH: loop header
LB: loop body
LE: loop exit
PB: predicated region body
PF: predicated region fallthrough
CT: control target
= control target key end

     0   :  { %10 = vsyncpa [#allocation4], 0  ;;  %s2732_s0 = inlined_call_operand.hbm [shape: f32[2,8,32], index: 0, kind: input, shape index: {}]   ;;  %s2733_s1 = inlined_call_operand.hbm [shape: f32[2,16,32], index: 1, kind: input, shape index: {}]   ;;  %s2734_s2 = inlined_call_operand.hbm [shape: f32[32,32], index: 2, kind: input, shape index: {}]   ;;  %s2735_s3 = inlined_call_operand.hbm [shape: f32[32,64], index: 3, kind: input, shape index: {}]   ;;  %s2736_s4 = inlined_call_operand.hbm [shape: f32[32,32], index: 4, kind: input, shape index: {}]   ;;  %s2737_s5 = inlined_call_operand.hbm [shape: f32[2,8,32], index: 5, kind: output, shape index: {}]  }
   0x1   :  { %11 = vsyncpa [#allocation7], 0 }
   0x2   :  { %12 = vsyncpa [#allocation10], 0 }
   0x3   :  { %13 = vsyncpa [#allocation5], 0  ;;  %s2395_s18 = smov [#allocation6]   ;;  %s2396_s20 = smov [#allocation9]  }
   0x4   :  { %s31_s19 = sshll.u32 %s2395_s18, 4  ;;  %s55_s21 = sshll.u32 %s2396_s20, 4  ;;  %s32_s19 = int_to_ptr.vmem [resolvable:$true] %s31_s19  ;;  %s2445_s21 = int_to_ptr.vmem [resolvable:$true] %s55_s21 }
   0x5   :  { %s2255_s24 = scalar_lea.hbm %s2733_s1, 512 }
   0x6   :  { %p2256_p0 = scmp.ne.s32.totalorder %s2733_s1, %s2255_s24  ;;  %p2259_p1 = scmp.lt.u32.totalorder %s2255_s24, %s2733_s1 }
   0x8   :  { %p2261_p2 = pnand %p2259_p1, %p2256_p0 }
   0xa   :  { %2264 = shalt.err (!%p2261_p2)
}
   0xb   :  { %s2265_s29 = scalar_lea.vmem %s32_s19, 512  ;;  %p2270_p4 = scmp.lt.s32.totalorder %s32_s19, %s32_s19 }
   0xc   :  { %p2266_p3 = scmp.ne.s32.totalorder %s32_s19, %s2265_s29  ;;  %p2271_p5 = scmp.lt.s32.totalorder %s2265_s29, %s2265_s29 }
   0xe   :  { %p2272_p6 = por %p2271_p5, %p2270_p4 }
  0x10   :  { %p2273_p7 = pnand %p2272_p6, %p2266_p3 }
  0x12   :  { %2276 = shalt.err (!%p2273_p7)
}
  0x13   :  { %s2397_s30 = smov 128   ;;  %s2398_s6 = smov 8  }
  0x14   :  { %37 = dma.hbm_to_vmem [thread:$0]  %s2733_s1, 512, %s32_s19, [#allocation7], %s2397_s30, %s2397_s30, %s2398_s6  }
  0x15   :  { %s2277_s11 = scalar_lea.hbm %s2735_s3, 512 }
  0x16   :  { %p2278_p8 = scmp.ne.s32.totalorder %s2735_s3, %s2277_s11  ;;  %p2281_p9 = scmp.lt.u32.totalorder %s2277_s11, %s2735_s3 }
  0x18   :  { %p2283_p10 = pnand %p2281_p9, %p2278_p8 }
  0x1a   :  { %2286 = shalt.err (!%p2283_p10)
}
  0x1b   :  { %s2287_s16 = scalar_lea.vmem %s2445_s21, 512  ;;  %p2292_p12 = scmp.lt.s32.totalorder %s2445_s21, %s2445_s21 }
  0x1c   :  { %p2288_p11 = scmp.ne.s32.totalorder %s2445_s21, %s2287_s16  ;;  %p2293_p13 = scmp.lt.s32.totalorder %s2287_s16, %s2287_s16 }
  0x1e   :  { %p2294_p0 = por %p2293_p13, %p2292_p12 }
  0x20   :  { %p2295_p1 = pnand %p2294_p0, %p2288_p11 }
  0x22   :  { %2298 = shalt.err (!%p2295_p1)
}
  0x23   :  { %61 = dma.hbm_to_vmem [thread:$0]  %s2735_s3, 512, %s2445_s21, [#allocation10], %s2397_s30, %s2397_s30, %s2398_s6  }
  0x24   :  { %s2399_s18 = smov [#allocation3]   ;;  %s2400_s20 = smov [#allocation8]  }
  0x25   :  { %s19_s19 = sshll.u32 %s2399_s18, 4  ;;  %s43_s22 = sshll.u32 %s2400_s20, 4  ;;  %s20_s19 = int_to_ptr.vmem [resolvable:$true] %s19_s19  ;;  %s2482_s22 = int_to_ptr.vmem [resolvable:$true] %s43_s22 }
  0x26   :  { %s2299_s25 = scalar_lea.hbm %s2732_s0, 256 }
  0x27   :  { %p2300_p2 = scmp.ne.s32.totalorder %s2732_s0, %s2299_s25  ;;  %p2303_p3 = scmp.lt.u32.totalorder %s2299_s25, %s2732_s0 }
  0x29   :  { %p2305_p4 = pnand %p2303_p3, %p2300_p2 }
  0x2b   :  { %2308 = shalt.err (!%p2305_p4)
}
  0x2c   :  { %s2309_s3 = scalar_lea.vmem %s20_s19, 256  ;;  %p2314_p6 = scmp.lt.s32.totalorder %s20_s19, %s20_s19 }
  0x2d   :  { %p2310_p5 = scmp.ne.s32.totalorder %s20_s19, %s2309_s3  ;;  %p2315_p7 = scmp.lt.s32.totalorder %s2309_s3, %s2309_s3 }
  0x2f   :  { %p2316_p8 = por %p2315_p7, %p2314_p6 }
  0x31   :  { %p2317_p9 = pnand %p2316_p8, %p2310_p5 }
  0x33   :  { %2320 = shalt.err (!%p2317_p9)
}
  0x34   :  { %25 = dma.hbm_to_vmem [thread:$0]  %s2732_s0, 256, %s20_s19, [#allocation4], %s2397_s30, %s2397_s30, %s2398_s6  }
  0x35   :  { %s2321_s10 = scalar_lea.hbm %s2734_s2, 512 }
  0x36   :  { %p2322_p10 = scmp.ne.s32.totalorder %s2734_s2, %s2321_s10  ;;  %p2325_p11 = scmp.lt.u32.totalorder %s2321_s10, %s2734_s2 }
  0x38   :  { %p2327_p12 = pnand %p2325_p11, %p2322_p10 }
  0x3a   :  { %2330 = shalt.err (!%p2327_p12)
}
  0x3b   :  { %s2331_s15 = scalar_lea.vmem %s2482_s22, 512  ;;  %p2336_p0 = scmp.lt.s32.totalorder %s2482_s22, %s2482_s22 }
  0x3c   :  { %p2332_p13 = scmp.ne.s32.totalorder %s2482_s22, %s2331_s15  ;;  %p2337_p1 = scmp.lt.s32.totalorder %s2331_s15, %s2331_s15 }
  0x3e   :  { %p2338_p2 = por %p2337_p1, %p2336_p0 }
  0x40   :  { %p2339_p3 = pnand %p2338_p2, %p2332_p13 }
  0x42   :  { %2342 = shalt.err (!%p2339_p3)
}
  0x43   :  { %49 = dma.hbm_to_vmem [thread:$0]  %s2734_s2, 512, %s2482_s22, [#allocation7], %s2397_s30, %s2397_s30, %s2398_s6  }
  0x44   :  { %s2401_s1 = smov [#allocation11]   ;;  %s2343_s20 = scalar_lea.hbm %s2736_s4, 512 }
  0x45   :  { %s67_s17 = sshll.u32 %s2401_s1, 4  ;;  %p2344_p4 = scmp.ne.s32.totalorder %s2736_s4, %s2343_s20  ;;  %s68_s17 = int_to_ptr.vmem [resolvable:$true] %s67_s17 }
  0x46   :  { %p2347_p5 = scmp.lt.u32.totalorder %s2343_s20, %s2736_s4 }
  0x48   :  { %p2349_p6 = pnand %p2347_p5, %p2344_p4 }
  0x4a   :  { %2352 = shalt.err (!%p2349_p6)
}
  0x4b   :  { %s2353_s27 = scalar_lea.vmem %s68_s17, 512  ;;  %p2358_p8 = scmp.lt.s32.totalorder %s68_s17, %s68_s17 }
  0x4c   :  { %p2354_p7 = scmp.ne.s32.totalorder %s68_s17, %s2353_s27  ;;  %p2359_p9 = scmp.lt.s32.totalorder %s2353_s27, %s2353_s27 }
  0x4e   :  { %p2360_p10 = por %p2359_p9, %p2358_p8 }
  0x50   :  { %p2361_p11 = pnand %p2360_p10, %p2354_p7 }
  0x52   :  { %2364 = shalt.err (!%p2361_p11)
}
  0x53   :  { %73 = dma.hbm_to_vmem [thread:$0]  %s2736_s4, 512, %s68_s17, [#allocation10], %s2397_s30, %s2397_s30, %s2398_s6  }
  0x54   :  { %2387 = dma.done.wait [#allocation4], 256  }
  0x55   :  { %2388 = vsyncadd [#allocation4], 4294967040 }
  0x56   :  { %2389 = dma.done.wait [#allocation7], 1024  }
  0x57   :  { %2390 = vsyncadd [#allocation7], 4294966272 }
  0x58   :  { %2391 = dma.done.wait [#allocation10], 1024  }
  0x59   :  { %2392 = vsyncadd [#allocation10], 4294966272  ;;  %vm99_vm0 = vcmask 261120   ;;  %v181_v0 = vld [vmem:[#allocation9] sm:$0xff]  ;;  %v182_v1 = vld [vmem:[#allocation9 + $0x8] sm:$0xff]  ;;  %v2402_v18 = vmov 0.0|0.0  }
  0x5a   :  { %v183_v2 = vld [vmem:[#allocation9 + $0x10] sm:$0xff]  ;;  %v2061_v3 = vpack.c.bf16 %v182_v1, %v181_v0  ;;  %v184_v4 = vld [vmem:[#allocation9 + $0x18] sm:$0xff]  ;;  %v91_v5 = vld [vmem:[#allocation6] sm:$0xff]  ;;  %vm2403_vm1 = vmmov 0   ;;  %v2404_v19 = vmov 0.0   ;;  %vm282_vm2 = vcmask 64512  }
  0x5b   :  { %v95_v6 = vld [vmem:[#allocation8] sm:$0xff]  ;;  %v2065_v7 = vpack.c.bf16 %v184_v4, %v183_v2  ;;  %1924 = vmatprep.mubr.msk.f32.mxu1 %vm99_vm0, %v91_v5  ;;  %v96_v8 = vld [vmem:[#allocation8 + $0x8] sm:$0xff]  ;;  %v97_v10 = vld [vmem:[#allocation8 + $0x10] sm:$0xff]  ;;  %s2405_s4 = smov 96   ;;  %s2406_s28 = smov 120   ;;  %vm441_vm4 = vcmask 130048  }
  0x5c   :  { %2062 = vmatprep.subr.bf16.mxu1 %v2061_v3  ;;  %v2053_v9 = vpack.c.bf16 %v96_v8, %v95_v6  ;;  %v98_v11 = vld [vmem:[#allocation8 + $0x18] sm:$0xff]  ;;  %v89_v13 = vld [vmem:[#allocation3] sm:$0xff]  ;;  %v92_v14 = vld [vmem:[#allocation6 + $0x8] sm:$0xff]  ;;  %s2407_s29 = smov 88   ;;  %s2408_s3 = smov 112   ;;  %vm976_vm5 = vcmask 130112  }
  0x5d   :  { %2064 = vmatpush3.bf16.msra.mxu1 %v2061_v3  ;;  %v2057_v12 = vpack.c.bf16 %v98_v11, %v97_v10  ;;  %1913 = vmatprep.mubr.msk.f32.mxu0 %vm99_vm0, %v89_v13  ;;  %v93_v15 = vld [vmem:[#allocation6 + $0x10] sm:$0xff]  ;;  %v90_v16 = vld [vmem:[#allocation3 + $0x8] sm:$0xff]  ;;  %vm2548_vm3 = vmpackc.low %vm282_vm2, %vm282_vm2  ;;  %s2409_s21 = smov 80   ;;  %s2410_s7 = smov 104   ;;  %vm1331_vm6 = vcmask 195712   ;;  %vm1686_vm7 = vcmask 261312  }
  0x5e   :  { %2066 = vmatprep.subr.bf16.mxu1 %v2065_v7  ;;  %2054 = vmatprep.subr.bf16.mxu0 %v2053_v9  ;;  %v94_v17 = vld [vmem:[#allocation6 + $0x18] sm:$0xff]  ;;  %s2411_s8 = smov 72   ;;  %s2412_s9 = smov 16  }
  0x5f   :  { %2056 = vmatpush3.bf16.msra.mxu0 %v2053_v9  ;;  %s2413_s10 = smov 24   ;;  %s2414_s11 = smov [#allocation12]  }
  0x60   :  { %2058 = vmatprep.subr.bf16.mxu0 %v2057_v12  ;;  %s1783_s12 = sshll.u32 %s2414_s11, 4  ;;  %s1784_s12 = int_to_ptr.vmem [resolvable:$true] %s1783_s12 }
  0x61   :  { %2068 = vmatpush3.bf16.msra.mxu1 %v2065_v7  ;;  %s2365_s13 = scalar_lea.vmem %s1784_s12, 256  ;;  %p2370_p13 = scmp.lt.s32.totalorder %s1784_s12, %s1784_s12 }
  0x62   :  { %2073 = vmatprep.subr.bf16.mxu1 %v2402_v18  ;;  %p2366_p12 = scmp.ne.s32.totalorder %s1784_s12, %s2365_s13  ;;  %p2371_p0 = scmp.lt.s32.totalorder %s2365_s13, %s2365_s13 }
  0x63   :  { %2060 = vmatpush3.bf16.msra.mxu0 %v2057_v12 }
  0x64   :  { %1925 = vmatmul.mubr.msk.f32.vlgmr.msra.gmra.mrb[0].mxu1 %vm99_vm0, %v92_v14  ;;  %2069 = vmatprep.subr.bf16.mxu0 %v2402_v18  ;;  %p2372_p1 = por %p2371_p0, %p2370_p13 }
  0x65   :  { %1927 = vmatprep.mubr.msk.f32.mxu1 %vm99_vm0, %v93_v15 }
  0x66   :  { %1914 = vmatmul.mubr.msk.f32.vlgmr.msra.gmra.mrb[0].mxu0 %vm99_vm0, %v90_v16  ;;  %p2373_p2 = pnand %p2372_p1, %p2366_p12 }
  0x67   :  { %1934 = vmatprep.mubr.msk.f32.mxu0 %vm2403_vm1, %v2404_v19 }
  0x68   :  { %1928 = vmatmul.mubr.msk.f32.gmra.mrb[2].mxu1 %vm99_vm0, %v94_v17 }
  0x69   :  { %1941 = vmatprep.mubr.msk.f32.mxu1 %vm2403_vm1, %v2404_v19 }
 0x137   :  { %v1926_v20 = vpop.f32.mrb[0].mxu1 }
 0x138   :  { %v263_v21 = vpop.f32.mrb[1].mxu1 }
 0x139   :  { %v2552_v23 = vpack.i.bf16 %v1926_v20, %v263_v21  ;;  %v2070_v24 = vpack.c.bf16 %v1926_v20, %v263_v21  ;;  %v2554_v25 = vpop.f32.mrb[0].mxu0 }
 0x13a   :  { %v2556_v26 = vpop.f32.mrb[1].mxu0 }
 0x13b   :  { %2154 = vrot.lane.b32.xlu1 %v2552_v23, %s2405_s4  ;;  %v1929_v27 = vpop.f32.mrb[2].mxu1  ;;  %2072 = vmatpush3.bf16.xpose.msk.msra.mxu0 %vm2548_vm3, %v2070_v24 }
 0x13c   :  { %v273_v28 = vpop.f32.mrb[3].mxu1  ;;  %2083 = vmatprep.subr.bf16.mxu0 %v2402_v18 }
 0x13d   :  { %v2562_v29 = vpack.i.bf16 %v1929_v27, %v273_v28  ;;  %v2074_v30 = vpack.c.bf16 %v1929_v27, %v273_v28 }
 0x13f   :  { %2159 = vrot.lane.b32.xlu1 %v2562_v29, %s2405_s4  ;;  %2076 = vmatpush3.bf16.xpose.msk.msra.mxu1 %vm2548_vm3, %v2074_v30 }
 0x140   :  { %2077 = vmatprep.subr.bf16.mxu1 %v2402_v18 }
 0x142   :  { %1935 = vmatmul.mubr.msk.f32.vlgmr.msra.gmra.mrb[2].mxu0 %vm282_vm2, %v2556_v26 }
 0x143   :  { %2169 = vrot.lane.b32.xlu1 %v2562_v29, %s2406_s28  ;;  %1962 = vmatprep.mubr.msk.f32.mxu0 %vm2403_vm1, %v2404_v19 }
 0x146   :  { %1942 = vmatmul.mubr.msk.f32.vlgmr.msra.gmra.mrb[4].mxu1 %vm282_vm2, %v2554_v25 }
 0x147   :  { %624 = vrot.lane.b32.xlu1 %v2556_v26, %s2406_s28  ;;  %1948 = vmatprep.mubr.msk.f32.mxu1 %vm2403_vm1, %v2404_v19 }
 0x14b   :  { %706 = vrot.lane.b32.xlu1 %v2554_v25, %s2406_s28 }
 0x14f   :  { %2174 = vrot.lane.b32.xlu1 %v2552_v23, %s2407_s29 }
 0x1ad   :  { %v2155_v31 = vpop.permute.xlu1 %2154 }
 0x1ae   :  { %v2157_v32 = vunpack.i.h.bf16 %v2155_v31  ;;  %v2156_v33 = vunpack.i.l.bf16 %v2155_v31 }
 0x1b0   :  { %v2078_v34 = vpack.c.bf16 %v2157_v32, %v2156_v33 }
 0x1b1   :  { %v2160_v41 = vpop.permute.xlu1 %2159 }
 0x1b2   :  { %2079 = vmatpush3.bf16.msra.mxu1 %v2078_v34  ;;  %v2162_v54 = vunpack.i.h.bf16 %v2160_v41  ;;  %v2161_v55 = vunpack.i.l.bf16 %v2160_v41 }
 0x1b3   :  { %2080 = vmatprep.subr.bf16.mxu1 %v2402_v18 }
 0x1b4   :  { %v2081_v59 = vpack.c.bf16 %v2162_v54, %v2161_v55 }
 0x1b5   :  { %v2170_v42 = vpop.permute.xlu1 %2169 }
 0x1b6   :  { %v2172_v0 = vunpack.i.h.bf16 %v2170_v42  ;;  %v2171_v1 = vunpack.i.l.bf16 %v2170_v42 }
 0x1b8   :  { %v2088_v2 = vpack.c.bf16 %v2172_v0, %v2171_v1 }
 0x1b9   :  { %v625_v43 = vpop.permute.xlu1 %624 }
 0x1bd   :  { %v707_v49 = vpop.permute.xlu1 %706 }
 0x1c1   :  { %v2175_v57 = vpop.permute.xlu1 %2174 }
 0x1c2   :  { %v2177_v60 = vunpack.i.h.bf16 %v2175_v57  ;;  %v2176_v61 = vunpack.i.l.bf16 %v2175_v57 }
 0x1c4   :  { %v2092_v63 = vpack.c.bf16 %v2177_v60, %v2176_v61 }
 0x215   :  { %v358_v35 = vpop.f32.mrb[2].mxu0 }
 0x216   :  { %v1936_v36 = vpop.f32.mrb[3].mxu0  ;;  %v442_v37 = vsel %vm441_vm4, %v358_v35, -inf }
 0x217   :  { %443 = vmax.xlane.f32.xlu0 %v442_v37 }
 0x219   :  { %v437_v38 = vpop.f32.mrb[4].mxu1 }
 0x21a   :  { %v1943_v39 = vpop.f32.mrb[5].mxu1  ;;  %v445_v40 = vsel %vm441_vm4, %v437_v38, -inf }
 0x21b   :  { %446 = vmax.xlane.f32.xlu0 %v445_v40 }
 0x231   :  { %2164 = vrot.lane.b32.xlu0 %v2552_v23, %s2406_s28 }
 0x2a4   :  { %v444_v44 = vpop.xlane.xlu0 %443 }
 0x2a5   :  { %v448_v45 = vsub.f32 %v358_v35, %v444_v44 }
 0x2a7   :  { %v450_v46 = vmul.f32 1.442695, %v448_v45 }
 0x2a8   :  { %v447_v47 = vpop.xlane.xlu0 %446 }
 0x2a9   :  { %2223 = vpow2.f32 %v450_v46  ;;  %v449_v48 = vsub.f32 %v437_v38, %v447_v47 }
 0x2ab   :  { %v452_v50 = vmul.f32 1.442695, %v449_v48 }
 0x2ac   :  { %v2165_v51 = vpop.permute.xlu0 %2164 }
 0x2ad   :  { %2225 = vpow2.f32 %v452_v50  ;;  %v2167_v52 = vunpack.i.h.bf16 %v2165_v51  ;;  %v2166_v53 = vunpack.i.l.bf16 %v2165_v51 }
 0x2af   :  { %v2084_v56 = vpack.c.bf16 %v2167_v52, %v2166_v53 }
 0x2b1   :  { %2086 = vmatpush3.bf16.xpose.msk.msra.mxu0 %vm2548_vm3, %v2084_v56 }
 0x2b2   :  { %2091 = vmatprep.subr.bf16.mxu0 %v2402_v18 }
 0x2b3   :  { %v2588_v58 = vpop.eup %2223 }
 0x2b4   :  { %1949 = vmatmul.mubr.msk.f32.vlgmr.msra.gmra.mrb[6].mxu1 %vm441_vm4, %v2588_v58 }
 0x2b5   :  { %2082 = vmatpush3.bf16.msra.mxu1 %v2081_v59  ;;  %1955 = vmatprep.mubr.msk.f32.mxu1 %vm2403_vm1, %v2404_v19 }
 0x2b6   :  { %2087 = vmatprep.subr.bf16.mxu1 %v2402_v18 }
 0x2b7   :  { %v2595_v62 = vpop.eup %2225 }
 0x2b8   :  { %1956 = vmatmul.mubr.msk.f32.vlgmr.msra.gmra.mrb[8].mxu1 %vm441_vm4, %v2595_v62  ;;  %1963 = vmatmul.mubr.msk.f32.vlgmr.msra.gmra.mrb[4].mxu0 %vm282_vm2, %v625_v43 }
 0x2b9   :  { %2093 = vmatpush3.bf16.msra.mxu0 %v2092_v63  ;;  %1969 = vmatprep.mubr.msk.f32.mxu1 %vm2403_vm1, %v2404_v19 }
 0x2ba   :  { %1976 = vmatprep.mubr.msk.f32.mxu0 %vm2403_vm1, %v2404_v19  ;;  %2097 = vmatprep.subr.bf16.mxu0 %v2402_v18 }
 0x2be   :  { %2090 = vmatpush3.bf16.xpose.msk.msra.mxu1 %vm2548_vm3, %v2088_v2 }
 0x2bf   :  { %2094 = vmatprep.subr.bf16.mxu1 %v2402_v18 }
 0x2c5   :  { %1970 = vmatmul.mubr.msk.f32.vlgmr.msra.gmra.mrb[10].mxu1 %vm282_vm2, %v707_v49 }
 0x2c6   :  { %1983 = vmatprep.mubr.msk.f32.mxu1 %vm2403_vm1, %v2404_v19 }
 0x387   :  { %v2611_v3 = vpop.f32.mrb[6].mxu1 }
 0x388   :  { %v1950_v4 = vpop.f32.mrb[7].mxu1 }
 0x38b   :  { %v2613_v5 = vpop.f32.mrb[8].mxu1  ;;  %v702_v6 = vpop.f32.mrb[4].mxu0 }
 0x38c   :  { %v1957_v7 = vpop.f32.mrb[9].mxu1  ;;  %v1964_v8 = vpop.f32.mrb[5].mxu0  ;;  %v788_v9 = vsel %vm441_vm4, %v702_v6, -inf }
 0x38d   :  { %789 = vmax.xlane.f32.xlu1 %v788_v9 }
 0x398   :  { %v784_v10 = vpop.f32.mrb[10].mxu1 }
 0x399   :  { %v1971_v11 = vpop.f32.mrb[11].mxu1  ;;  %v791_v12 = vsel %vm441_vm4, %v784_v10, -inf }
 0x39a   :  { %792 = vmax.xlane.f32.xlu0 %v791_v12 }
 0x39e   :  { %2184 = vrot.lane.b32.xlu1 %v2552_v23, %s2408_s3 }
 0x3a2   :  { %2189 = vrot.lane.b32.xlu1 %v2562_v29, %s2408_s3 }
 0x3a6   :  { %979 = vrot.lane.b32.xlu1 %v2556_v26, %s2408_s3 }
 0x3aa   :  { %2199 = vrot.lane.b32.xlu1 %v2562_v29, %s2409_s21 }
 0x3ae   :  { %2204 = vrot.lane.b32.xlu1 %v2552_v23, %s2410_s7 }
 0x3b0   :  { %2179 = vrot.lane.b32.xlu0 %v2562_v29, %s2407_s29 }
 0x3b4   :  { %1061 = vrot.lane.b32.xlu0 %v2554_v25, %s2408_s3 }
 0x3b8   :  { %2194 = vrot.lane.b32.xlu0 %v2552_v23, %s2409_s21 }
 0x41a   :  { %v790_v13 = vpop.xlane.xlu1 %789 }
 0x41b   :  { %v794_v14 = vsub.f32 %v702_v6, %v790_v13 }
 0x41d   :  { %v796_v15 = vmul.f32 1.442695, %v794_v14 }
 0x41e   :  { %v2185_v16 = vpop.permute.xlu1 %2184 }
 0x41f   :  { %2227 = vpow2.f32 %v796_v15  ;;  %v2187_v17 = vunpack.i.h.bf16 %v2185_v16  ;;  %v2186_v20 = vunpack.i.l.bf16 %v2185_v16 }
 0x421   :  { %v2098_v28 = vpack.c.bf16 %v2187_v17, %v2186_v20 }
 0x422   :  { %v2190_v31 = vpop.permute.xlu1 %2189 }
 0x423   :  { %v2192_v38 = vunpack.i.h.bf16 %v2190_v31  ;;  %v2191_v39 = vunpack.i.l.bf16 %v2190_v31 }
 0x425   :  { %v2102_v45 = vpack.c.bf16 %v2192_v38, %v2191_v39 }
 0x426   :  { %v980_v37 = vpop.permute.xlu1 %979 }
 0x427   :  { %v793_v21 = vpop.xlane.xlu0 %792 }
 0x428   :  { %v795_v24 = vsub.f32 %v784_v10, %v793_v21 }
 0x429   :  { %v2627_v27 = vpop.eup %2227 }
 0x42a   :  { %v798_v30 = vmul.f32 1.442695, %v795_v24  ;;  %1977 = vmatmul.mubr.msk.f32.vlgmr.msra.gmra.mrb[6].mxu0 %vm441_vm4, %v2627_v27  ;;  %v2200_v46 = vpop.permute.xlu1 %2199 }
 0x42b   :  { %v2180_v32 = vpop.permute.xlu0 %2179  ;;  %2100 = vmatpush3.bf16.xpose.msk.msra.mxu0 %vm2548_vm3, %v2098_v28  ;;  %1990 = vmatprep.mubr.msk.f32.mxu0 %vm2403_vm1, %v2404_v19  ;;  %v2202_v47 = vunpack.i.h.bf16 %v2200_v46  ;;  %v2201_v48 = vunpack.i.l.bf16 %v2200_v46 }
 0x42c   :  { %2229 = vpow2.f32 %v798_v30  ;;  %v2182_v33 = vunpack.i.h.bf16 %v2180_v32  ;;  %v2181_v34 = vunpack.i.l.bf16 %v2180_v32  ;;  %2105 = vmatprep.subr.bf16.mxu0 %v2402_v18 }
 0x42d   :  { %v2109_v49 = vpack.c.bf16 %v2202_v47, %v2201_v48  ;;  %v454_v47 = vsel %vm441_vm4, %v2588_v58, 0.0 }
 0x42e   :  { %v2095_v35 = vpack.c.bf16 %v2182_v33, %v2181_v34  ;;  %v2205_v61 = vpop.permute.xlu1 %2204 }
 0x42f   :  { %v1062_v36 = vpop.permute.xlu0 %1061  ;;  %v2207_v2 = vunpack.i.h.bf16 %v2205_v61  ;;  %v2206_v4 = vunpack.i.l.bf16 %v2205_v61 }
 0x430   :  { %2096 = vmatpush3.bf16.msra.mxu1 %v2095_v35 }
 0x431   :  { %2101 = vmatprep.subr.bf16.mxu1 %v2402_v18  ;;  %v2112_v8 = vpack.c.bf16 %v2207_v2, %v2206_v4 }
 0x432   :  { %1991 = vmatmul.mubr.msk.f32.vlgmr.msra.gmra.mrb[8].mxu0 %vm282_vm2, %v980_v37 }
 0x433   :  { %v2195_v40 = vpop.permute.xlu0 %2194  ;;  %2004 = vmatprep.mubr.msk.f32.mxu0 %vm2403_vm1, %v2404_v19 }
 0x434   :  { %v2197_v41 = vunpack.i.h.bf16 %v2195_v40  ;;  %v2196_v42 = vunpack.i.l.bf16 %v2195_v40 }
 0x436   :  { %v2640_v43 = vpop.eup %2229  ;;  %v2106_v44 = vpack.c.bf16 %v2197_v41, %v2196_v42 }
 0x437   :  { %1984 = vmatmul.mubr.msk.f32.vlgmr.msra.gmra.mrb[12].mxu1 %vm441_vm4, %v2640_v43  ;;  %v803_v33 = vsel %vm441_vm4, %v2640_v43, 0.0 }
 0x438   :  { %2107 = vmatpush3.bf16.msra.mxu0 %v2106_v44  ;;  %1997 = vmatprep.mubr.msk.f32.mxu1 %vm2403_vm1, %v2404_v19 }
 0x439   :  { %2104 = vmatpush3.bf16.xpose.msk.msra.mxu1 %vm2548_vm3, %v2102_v45  ;;  %2111 = vmatprep.subr.bf16.mxu0 %v2402_v18 }
 0x43a   :  { %2108 = vmatprep.subr.bf16.mxu1 %v2402_v18 }
 0x440   :  { %1998 = vmatmul.mubr.msk.f32.vlgmr.msra.gmra.mrb[14].mxu1 %vm282_vm2, %v1062_v36 }
 0x441   :  { %2110 = vmatpush3.bf16.msra.mxu1 %v2109_v49  ;;  %2011 = vmatprep.mubr.msk.f32.mxu1 %vm2403_vm1, %v2404_v19 }
 0x442   :  { %2115 = vmatprep.subr.bf16.mxu1 %v2402_v18 }
 0x4fd   :  { %v2654_v50 = vpop.f32.mrb[6].mxu0 }
 0x4fe   :  { %v1978_v51 = vpop.f32.mrb[7].mxu0 }
 0x505   :  { %v1057_v52 = vpop.f32.mrb[8].mxu0 }
 0x506   :  { %v1992_v53 = vpop.f32.mrb[9].mxu0  ;;  %v1143_v54 = vsel %vm441_vm4, %v1057_v52, -inf }
 0x507   :  { %1144 = vmax.xlane.f32.xlu1 %v1143_v54 }
 0x50a   :  { %v2657_v55 = vpop.f32.mrb[12].mxu1 }
 0x50b   :  { %v1985_v56 = vpop.f32.mrb[13].mxu1 }
 0x513   :  { %v1139_v57 = vpop.f32.mrb[14].mxu1 }
 0x514   :  { %v1999_v59 = vpop.f32.mrb[15].mxu1  ;;  %v1146_v60 = vsel %vm441_vm4, %v1139_v57, -inf }
 0x515   :  { %1147 = vmax.xlane.f32.xlu0 %v1146_v60 }
 0x518   :  { %1334 = vrot.lane.b32.xlu1 %v2556_v26, %s2410_s7 }
 0x52b   :  { %2209 = vrot.lane.b32.xlu0 %v2562_v29, %s2410_s7 }
 0x52f   :  { %1416 = vrot.lane.b32.xlu0 %v2554_v25, %s2410_s7 }
 0x594   :  { %v1145_v63 = vpop.xlane.xlu1 %1144 }
 0x595   :  { %v1149_v0 = vsub.f32 %v1057_v52, %v1145_v63  ;;  %v457_v52 = vsel %vm441_vm4, %v2595_v62, 0.0 }
 0x597   :  { %v1151_v1 = vmul.f32 1.442695, %v1149_v0 }
 0x598   :  { %v1335_v10 = vpop.permute.xlu1 %1334 }
 0x599   :  { %2231 = vpow2.f32 %v1151_v1 }
 0x5a2   :  { %v1148_v6 = vpop.xlane.xlu0 %1147 }
 0x5a3   :  { %v2232_v7 = vpop.eup %2231  ;;  %v1150_v9 = vsub.f32 %v1139_v57, %v1148_v6 }
 0x5a4   :  { %2005 = vmatmul.mubr.msk.f32.vlgmr.msra.gmra.mrb[10].mxu0 %vm441_vm4, %v2232_v7  ;;  %v1155_v34 = vsel %vm441_vm4, %v2232_v7, 0.0 }
 0x5a5   :  { %v1153_v26 = vmul.f32 1.442695, %v1150_v9  ;;  %2114 = vmatpush3.bf16.xpose.msk.msra.mxu0 %vm2548_vm3, %v2112_v8  ;;  %2018 = vmatprep.mubr.msk.f32.mxu0 %vm2403_vm1, %v2404_v19 }
 0x5a6   :  { %2119 = vmatprep.subr.bf16.mxu0 %v2402_v18  ;;  %v2210_v25 = vpop.permute.xlu0 %2209 }
 0x5a7   :  { %2233 = vpow2.f32 %v1153_v26  ;;  %v2212_v11 = vunpack.i.h.bf16 %v2210_v25  ;;  %v2211_v12 = vunpack.i.l.bf16 %v2210_v25 }
 0x5a9   :  { %v2116_v14 = vpack.c.bf16 %v2212_v11, %v2211_v12  ;;  %v1692_v12 = vld [vmem:[#allocation11 + $0x8] sm:$0xff] }
 0x5aa   :  { %v1417_v15 = vpop.permute.xlu0 %1416 }
 0x5ac   :  { %2019 = vmatmul.mubr.msk.f32.vlgmr.msra.gmra.mrb[12].mxu0 %vm282_vm2, %v1335_v10 }
 0x5ad   :  { %2032 = vmatprep.mubr.msk.f32.mxu0 %vm2403_vm1, %v2404_v19 }
 0x5b1   :  { %v2234_v13 = vpop.eup %2233 }
 0x5b2   :  { %2012 = vmatmul.mubr.msk.f32.vlgmr.msra.gmra.mrb[16].mxu1 %vm441_vm4, %v2234_v13  ;;  %v1158_v32 = vsel %vm441_vm4, %v2234_v13, 0.0 }
 0x5b3   :  { %2118 = vmatpush3.bf16.xpose.msk.msra.mxu1 %vm2548_vm3, %v2116_v14  ;;  %2025 = vmatprep.mubr.msk.f32.mxu1 %vm2403_vm1, %v2404_v19  ;;  %v1693_v14 = vld [vmem:[#allocation11 + $0x10] sm:$0xff] }
 0x5b4   :  { %2122 = vmatprep.subr.bf16.mxu1 %v2402_v18 }
 0x5ba   :  { %2026 = vmatmul.mubr.msk.f32.vlgmr.msra.gmra.mrb[18].mxu1 %vm282_vm2, %v1417_v15  ;;  %v1694_v15 = vld [vmem:[#allocation11 + $0x18] sm:$0xff] }
 0x5bb   :  { %2039 = vmatprep.mubr.msk.f32.mxu1 %vm2403_vm1, %v2404_v19  ;;  %v800_v19 = vsel %vm441_vm4, %v2627_v27, 0.0 }
 0x677   :  { %v2684_v16 = vpop.f32.mrb[10].mxu0 }
 0x678   :  { %v2006_v17 = vpop.f32.mrb[11].mxu0 }
 0x67f   :  { %v1412_v20 = vpop.f32.mrb[12].mxu0 }
 0x680   :  { %v2020_v21 = vpop.f32.mrb[13].mxu0  ;;  %v1498_v24 = vsel %vm441_vm4, %v1412_v20, -inf }
 0x681   :  { %1499 = vmax.xlane.f32.xlu1 %v1498_v24 }
 0x685   :  { %v1315_v22 = vpop.f32.mrb[16].mxu1 }
 0x686   :  { %v2013_v28 = vpop.f32.mrb[17].mxu1 }
 0x68d   :  { %v1494_v30 = vpop.f32.mrb[18].mxu1 }
 0x68e   :  { %v2027_v31 = vpop.f32.mrb[19].mxu1  ;;  %v1501_v18 = vsel %vm441_vm4, %v1494_v30, -inf }
 0x68f   :  { %1502 = vmax.xlane.f32.xlu0 %v1501_v18 }
 0x692   :  { %2219 = vrot.lane.b32.xlu1 %v2562_v29, %s2411_s8 }
 0x6a5   :  { %2214 = vrot.lane.b32.xlu0 %v2552_v23, %s2411_s8 }
 0x6b6   :  { %801 = vadd.xlane.f32.xlu1 %v800_v19 }
 0x6ba   :  { %1159 = vadd.xlane.f32.xlu1 %v1158_v32 }
 0x6c4   :  { %804 = vadd.xlane.f32.xlu0 %v803_v33 }
 0x6c8   :  { %1156 = vadd.xlane.f32.xlu0 %v1155_v34 }
 0x70e   :  { %v1500_v35 = vpop.xlane.xlu1 %1499 }
 0x70f   :  { %v1504_v36 = vsub.f32 %v1412_v20, %v1500_v35 }
 0x711   :  { %v1506_v37 = vmul.f32 1.442695, %v1504_v36 }
 0x712   :  { %v2220_v29 = vpop.permute.xlu1 %2219 }
 0x713   :  { %2235 = vpow2.f32 %v1506_v37  ;;  %v2222_v23 = vunpack.i.h.bf16 %v2220_v29  ;;  %v2221_v38 = vunpack.i.l.bf16 %v2220_v29 }
 0x715   :  { %v2123_v39 = vpack.c.bf16 %v2222_v23, %v2221_v38 }
 0x717   :  { %2124 = vmatpush3.bf16.msra.mxu1 %v2123_v39 }
 0x71c   :  { %v1503_v27 = vpop.xlane.xlu0 %1502 }
 0x71d   :  { %v2236_v40 = vpop.eup %2235  ;;  %v1505_v41 = vsub.f32 %v1494_v30, %v1503_v27 }
 0x71e   :  { %v1510_v42 = vsel %vm441_vm4, %v2236_v40, 0.0 }
 0x71f   :  { %v1508_v44 = vmul.f32 1.442695, %v1505_v41  ;;  %1511 = vadd.xlane.f32.xlu0 %v1510_v42 }
 0x720   :  { %v2215_v43 = vpop.permute.xlu0 %2214 }
 0x721   :  { %2237 = vpow2.f32 %v1508_v44  ;;  %v2217_v45 = vunpack.i.h.bf16 %v2215_v43  ;;  %v2216_v46 = vunpack.i.l.bf16 %v2215_v43 }
 0x723   :  { %v2120_v48 = vpack.c.bf16 %v2217_v45, %v2216_v46  ;;  %455 = vadd.xlane.f32.xlu0 %v454_v47 }
 0x725   :  { %2121 = vmatpush3.bf16.msra.mxu0 %v2120_v48 }
 0x728   :  { %2033 = vmatmul.mubr.msk.f32.vlgmr.msra.gmra.mrb[14].mxu0 %vm441_vm4, %v2236_v40 }
 0x72b   :  { %v2238_v49 = vpop.eup %2237 }
 0x72c   :  { %2040 = vmatmul.mubr.msk.f32.vlgmr.msra.gmra.mrb[20].mxu1 %vm441_vm4, %v2238_v49  ;;  %v1513_v51 = vsel %vm441_vm4, %v2238_v49, 0.0 }
 0x72d   :  { %1514 = vadd.xlane.f32.xlu1 %v1513_v51 }
 0x731   :  { %458 = vadd.xlane.f32.xlu1 %v457_v52 }
 0x743   :  { %v802_v53 = vpop.xlane.xlu1 %801 }
 0x744   :  { %2239 = vrcp.f32 %v802_v53 }
 0x747   :  { %v1160_v54 = vpop.xlane.xlu1 %1159 }
 0x748   :  { %2241 = vrcp.f32 %v1160_v54 }
 0x74e   :  { %v2240_v58 = vpop.eup %2239 }
 0x74f   :  { %v965_v56 = vmul.f32 %v2240_v58, %v2654_v50 }
 0x751   :  { %v805_v57 = vpop.xlane.xlu0 %804  ;;  %970 = vrot.lane.b32.xlu0 %v965_v56, %s2398_s6 }
 0x752   :  { %v2242_v59 = vpop.eup %2241  ;;  %2243 = vrcp.f32 %v805_v57 }
 0x753   :  { %v1322_v60 = vmul.f32 %v2242_v59, %v1315_v22 }
 0x755   :  { %v1157_v61 = vpop.xlane.xlu0 %1156  ;;  %1327 = vrot.lane.b32.xlu0 %v1322_v60, %s2412_s9 }
 0x756   :  { %2245 = vrcp.f32 %v1157_v61 }
 0x75c   :  { %v2244_v63 = vpop.eup %2243 }
 0x75d   :  { %v967_v62 = vmul.f32 %v2244_v63, %v2657_v55 }
 0x75f   :  { %972 = vrot.lane.b32.xlu1 %v967_v62, %s2398_s6 }
 0x760   :  { %v2246_v0 = vpop.eup %2245 }
 0x761   :  { %v1320_v1 = vmul.f32 %v2246_v0, %v2684_v16  ;;  %v2129_v16 = vpack.c.bf16 %v1694_v15, %v1693_v14 }
 0x763   :  { %1325 = vrot.lane.b32.xlu1 %v1320_v1, %s2412_s9 }
 0x7ac   :  { %v1512_v50 = vpop.xlane.xlu0 %1511 }
 0x7b0   :  { %v456_v2 = vpop.xlane.xlu0 %455 }
 0x7b1   :  { %2247 = vrcp.f32 %v456_v2 }
 0x7ba   :  { %v1515_v4 = vpop.xlane.xlu1 %1514 }
 0x7bb   :  { %v2248_v6 = vpop.eup %2247 }
 0x7bc   :  { %v619_v7 = vmul.f32 %v2248_v6, %v2611_v3  ;;  %v1691_v3 = vld [vmem:[#allocation11] sm:$0xff] }
 0x7bd   :  { %v2125_v13 = vpack.c.bf16 %v1692_v12, %v1691_v3 }
 0x7be   :  { %622 = vst.msk [vmem:[#allocation2] sm:$0xff] %vm282_vm2, %v619_v7  ;;  %v459_v8 = vpop.xlane.xlu1 %458 }
 0x7bf   :  { %2249 = vrcp.f32 %v459_v8  ;;  %2126 = vmatprep.subr.bf16.mxu0 %v2125_v13 }
 0x7c0   :  { %2251 = vrcp.f32 %v1512_v50  ;;  %2128 = vmatpush3.bf16.msra.mxu0 %v2125_v13 }
 0x7c1   :  { %2253 = vrcp.f32 %v1515_v4  ;;  %2130 = vmatprep.subr.bf16.mxu0 %v2129_v16 }
 0x7c3   :  { %v971_v9 = vpop.permute.xlu0 %970 }
 0x7c4   :  { %977 = vst.msk [vmem:[#allocation2] sm:$0xff] %vm976_vm5, %v971_v9  ;;  %2132 = vmatpush3.bf16.msra.mxu0 %v2129_v16 }
 0x7c7   :  { %v1328_v10 = vpop.permute.xlu0 %1327 }
 0x7c9   :  { %v2250_v55 = vpop.eup %2249 }
 0x7ca   :  { %v621_v26 = vmul.f32 %v2250_v55, %v2613_v5  ;;  %v2252_v5 = vpop.eup %2251 }
 0x7cb   :  { %v2254_v24 = vpop.eup %2253 }
 0x7cc   :  { %623 = vst.msk [vmem:[#allocation2 + $0x8] sm:$0xff] %vm282_vm2, %v621_v26 }
 0x7d1   :  { %v973_v25 = vpop.permute.xlu1 %972 }
 0x7d2   :  { %978 = vst.msk [vmem:[#allocation2 + $0x8] sm:$0xff] %vm976_vm5, %v973_v25 }
 0x7d3   :  { %1333 = vst.msk [vmem:[#allocation2 + $0x8] sm:$0xff] %vm1331_vm6, %v1328_v10 }
 0x7d5   :  { %v1326_v11 = vpop.permute.xlu1 %1325 }
 0x7d6   :  { %1332 = vst.msk [vmem:[#allocation2] sm:$0xff] %vm1331_vm6, %v1326_v11 }
 0x7fb   :  { %v1591_v17 = vpop.f32.mrb[14].mxu0 }
 0x7fc   :  { %v1675_v20 = vmul.f32 %v2252_v5, %v1591_v17  ;;  %v2034_v21 = vpop.f32.mrb[15].mxu0 }
 0x7fe   :  { %1680 = vrot.lane.b32.xlu1 %v1675_v20, %s2413_s10 }
 0x7ff   :  { %v1670_v22 = vpop.f32.mrb[20].mxu1 }
 0x800   :  { %v1677_v28 = vmul.f32 %v2254_v24, %v1670_v22  ;;  %v2041_v30 = vpop.f32.mrb[21].mxu1 }
 0x802   :  { %1682 = vrot.lane.b32.xlu0 %v1677_v28, %s2413_s10 }
 0x870   :  { %v1681_v31 = vpop.permute.xlu1 %1680 }
 0x871   :  { %1687 = vst.msk [vmem:[#allocation2] sm:$0xff] %vm1686_vm7, %v1681_v31 }
 0x874   :  { %v1683_v18 = vpop.permute.xlu0 %1682 }
 0x875   :  { %1688 = vst.msk [vmem:[#allocation2 + $0x8] sm:$0xff] %vm1686_vm7, %v1683_v18 }
 0x878   :  { %v1689_v19 = vld [vmem:[#allocation2] sm:$0xff] }
 0x879   :  { %2050 = vmatprep.mubr.msk.f32.mxu0 %vm99_vm0, %v1689_v19 }
 0x87c   :  { %v1690_v32 = vld [vmem:[#allocation2 + $0x8] sm:$0xff] }
 0x87d   :  { %2051 = vmatmul.mubr.msk.f32.vlgmr.msra.gmra.mrb[16].mxu0 %vm99_vm0, %v1690_v32 }
 0x950   :  { %v2052_v33 = vpop.f32.mrb[16].mxu0 }
 0x951   :  { %1777 = vst.msk [vmem:[#allocation12 + $0x8] sm:$0xff] %vm99_vm0, %v2052_v33  ;;  %v1767_v34 = vpop.f32.mrb[17].mxu0 }
 0x952   :  { %1776 = vst.msk [vmem:[#allocation12] sm:$0xff] %vm99_vm0, %v1767_v34 }
 0x953   :  { %2376 = shalt.err (!%p2373_p2)
}
 0x954   :  { %s2377_s0 = scalar_lea.hbm %s2737_s5, 256 }
 0x955   :  { %p2378_p3 = scmp.ne.s32.totalorder %s2737_s5, %s2377_s0  ;;  %p2381_p4 = scmp.lt.u32.totalorder %s2377_s0, %s2737_s5 }
 0x957   :  { %p2383_p5 = pnand %p2381_p4, %p2378_p3 }
 0x959   :  { %2386 = shalt.err (!%p2383_p5)
}
 0x95a   :  { %1789 = dma.vmem_to_hbm [thread:$0]  %s1784_s12, 256, %s2737_s5, [#allocation5], %s2397_s30, %s2397_s30, %s2398_s6  }
 0x95b   :  { %2393 = dma.done.wait [#allocation5], 256  }
 0x95c   :  { %2394 = vsyncadd [#allocation5], 4294967040 }
 0x95d   :  { %1793 = vsyncpa [#allocation4], 1 }
 0x95e   :  { %1794 = vsyncpa [#allocation7], 1 }
 0x95f   :  { %1795 = vsyncpa [#allocation10], 1 }
 0x960   :  { %1796 = vsyncpa [#allocation5], 1 }

</bundles_post_ra>
